<compile_context>
chip_gen: v7x
topology: tpu7x:2x2x1
jax: 0.10.0
libtpu: 0.0.40
codegen_flags: <defaults>
</compile_context>

<pallas_src>
import jax
import jax.numpy as jnp
import numpy as np
from jax.experimental import pallas as pl
from jax.experimental.pallas import tpu as pltpu

SELU_SCALE = 1.0507009873554805
SELU_ALPHA = 1.6732632423543772
LN_EPS = 1e-5


def _round_up(x, m):
    return (x + m - 1) // m * m


def _selu(v):
    # exp() on the untaken (v > 0) branch may overflow to inf; it is discarded
    # by the select (benign in f32 -- revisit if elementwise math moves to bf16).
    return SELU_SCALE * jnp.where(v > 0, v, SELU_ALPHA * (jnp.exp(v) - 1.0))


# ----------------------------- fused kernel ----------------------------------
def make_kernel(out_dim, d_ln, Cp, Op, resnet):
    """Whole ENVEncoderBuilder forward for one (TB, in_dim) batch tile."""
    n_pad = Cp - d_ln            # zero-padding lanes in the packed concat layout
    inv_d = 1.0 / d_ln

    def layernorm(c, g, b):
        # Pad lanes of `c` are exactly 0, so sum/d_ln gives the exact mean, and
        # their contribution to sum((c - mean)^2) is exactly n_pad * mean^2:
        # subtract it analytically instead of a full-width mask multiply.
        mean = jnp.sum(c, axis=-1, keepdims=True) * inv_d
        d = c - mean
        ssq = jnp.sum(d * d, axis=-1, keepdims=True) - n_pad * (mean * mean)
        inv = jax.lax.rsqrt(ssq * inv_d + LN_EPS)
        # pad lanes: g == 0 and b == 0  ->  output stays exactly 0
        return d * inv * g + b

    def body(xu, w1, w2, w3, vec, xu_sc):
        b1 = vec[0:1, :Cp]
        b2 = vec[1:2, :Cp]
        g1 = vec[2:3, :Cp]
        be1 = vec[3:4, :Cp]
        g2 = vec[4:5, :Cp]
        be2 = vec[5:6, :Cp]
        b3 = vec[6:7, :Op]

        # l1 + selu      (lanes [hidden, Cp) see selu(0 + 0) == 0)
        h = _selu(jnp.dot(xu, w1, preferred_element_type=jnp.float32) + b1)
        # concat == add xu scattered into lanes [hidden, hidden+in)
        c = h + xu_sc if resnet else h
        c = layernorm(c, g1, be1)
        # l2 + selu
        h2 = _selu(jnp.dot(c, w2, preferred_element_type=jnp.float32) + b2)
        c2 = h2 + xu_sc if resnet else h2
        c2 = layernorm(c2, g2, be2)
        # l3 (no activation)
        return jnp.dot(c2, w3, preferred_element_type=jnp.float32) + b3

    if resnet:
        def kernel(xu_ref, w1_ref, s_ref, w2_ref, w3_ref, vec_ref, o_ref):
            xu = xu_ref[...]                                   # (TB, in_dim)
            # place xu into lanes [hidden, hidden+in) via one tiny MXU matmul
            # against a constant selection matrix (no in-kernel lane shuffles).
            xu_sc = jnp.dot(xu, s_ref[...], preferred_element_type=jnp.float32)
            out = body(xu, w1_ref[...], w2_ref[...], w3_ref[...],
                       vec_ref[...], xu_sc)
            o_ref[...] = out[:, :out_dim]
    else:
        def kernel(xu_ref, w1_ref, w2_ref, w3_ref, vec_ref, o_ref):
            out = body(xu_ref[...], w1_ref[...], w2_ref[...], w3_ref[...],
                       vec_ref[...], None)
            o_ref[...] = out[:, :out_dim]

    return kernel


# --------------------------- host-side padding --------------------------------
def pad_params(p, in_dim, hidden_dim, out_dim, resnet):
    """Zero-pad weights into the packed 128-lane concat layout.

    Packed layout (one lane group, width Cp = round_up(hidden+in, 128)):
        lanes [0, hidden)          -> selu(l1/l2 outputs)
        lanes [hidden, hidden+in)  -> xu            (resnet concat)
        lanes [hidden+in, Cp)      -> exact zeros
    This matches PyTorch's cat([x, xu]) ordering, so l2/l3 weight rows and the
    LN gamma/beta stay contiguous -- only zero-padding, no row scatter.
    """
    d_ln = hidden_dim + in_dim if resnet else hidden_dim
    Cp = _round_up(d_ln, 128)
    Op = _round_up(out_dim, 128)
    Vw = max(Cp, Op)
    f32 = jnp.float32

    w1 = jnp.zeros((in_dim, Cp), f32).at[:, :hidden_dim].set(p["w1"])
    w2 = jnp.zeros((Cp, Cp), f32).at[:d_ln, :hidden_dim].set(p["w2"])
    w3 = jnp.zeros((Cp, Op), f32).at[:d_ln, :out_dim].set(p["w3"])

    # pack all bias / LN vectors into one (8, Vw) block -> single arg / DMA
    vec = jnp.zeros((8, Vw), f32)
    vec = vec.at[0, :hidden_dim].set(p["b1"])
    vec = vec.at[1, :hidden_dim].set(p["b2"])
    vec = vec.at[2, :d_ln].set(p["g1"])
    vec = vec.at[3, :d_ln].set(p["be1"])
    vec = vec.at[4, :d_ln].set(p["g2"])
    vec = vec.at[5, :d_ln].set(p["be2"])
    vec = vec.at[6, :out_dim].set(p["b3"])

    if resnet:
        # 0/1 selection matrix: xu[k] -> lane hidden_dim + k
        s = jnp.zeros((in_dim, Cp), f32).at[
            jnp.arange(in_dim), hidden_dim + jnp.arange(in_dim)].set(1.0)
        w_args = [w1, s, w2, w3, vec]
    else:
        w_args = [w1, w2, w3, vec]
    return w_args, (d_ln, Cp, Op)


# ------------------------------- wrapper --------------------------------------
def env_decoder_forward(x, params, resnet=True, block_b=512):
    """x: (N, in_dim) float32 -> (N, out_dim) float32."""
    N, in_dim = x.shape
    hidden_dim = params["w1"].shape[1]
    out_dim = params["w3"].shape[1]

    w_args, (d_ln, Cp, Op) = pad_params(params, in_dim, hidden_dim, out_dim,
                                        resnet)

    # Batch: sublane-aligned tiles over a "parallel" grid axis (megacore /
    # dual-TC friendly).  HBM feature dims stay UNPADDED (full-dim blocks are
    # legal), so DMA bytes ~= real bytes.  Sweep block_b in 512..2048.
    N_pad = _round_up(max(N, 8), 8)
    TB = min(block_b, N_pad)
    N_pad = _round_up(N_pad, TB)
    xu_p = x if N_pad == N else (
        jnp.zeros((N_pad, in_dim), jnp.float32).at[:N].set(x))

    kernel = make_kernel(out_dim, d_ln, Cp, Op, resnet)

    def const(b):
        return (0, 0)

    in_specs = ([pl.BlockSpec((TB, in_dim), lambda b: (b, 0))]
                + [pl.BlockSpec(a.shape, const) for a in w_args])

    # real (unpadded) work, for XLA's scheduler
    flops = 2 * N * (in_dim * hidden_dim + d_ln * hidden_dim + d_ln * out_dim)
    transcendentals = 2 * N * hidden_dim + 2 * N
    bytes_accessed = 4 * (N * (in_dim + out_dim) + in_dim * hidden_dim
                          + d_ln * hidden_dim + d_ln * out_dim
                          + 2 * hidden_dim + out_dim + 4 * d_ln)

    out = pl.pallas_call(
        kernel,
        out_shape=jax.ShapeDtypeStruct((N_pad, out_dim), jnp.float32),
        grid=(N_pad // TB,),
        in_specs=in_specs,
        out_specs=pl.BlockSpec((TB, out_dim), lambda b: (b, 0)),
        compiler_params=pltpu.CompilerParams(
            dimension_semantics=("parallel",),
            vmem_limit_bytes=32 * 1024 * 1024),
        cost_estimate=pl.CostEstimate(
            flops=int(flops), transcendentals=int(transcendentals),
            bytes_accessed=int(bytes_accessed)),
    )(xu_p, *w_args)

    return out[:N]


# --------------------------- params / reference --------------------------------
def init_params(in_dim, out_dim, hidden_dim, resnet=True, seed=0):
    """xavier_uniform weights; biases / LN params given small noise so every
    add path is exercised (forward semantics identical to the PyTorch init)."""
    c_dim = (in_dim + hidden_dim) if resnet else hidden_dim
    key = jax.random.PRNGKey(seed)
    ks = jax.random.split(key, 12)

    def xavier(k, shape):
        lim = (6.0 / (shape[0] + shape[1])) ** 0.5
        return jax.random.uniform(k, shape, jnp.float32, -lim, lim)

    return dict(
        w1=xavier(ks[0], (in_dim, hidden_dim)),
        b1=0.01 * jax.random.normal(ks[1], (hidden_dim,), jnp.float32),
        w2=xavier(ks[2], (c_dim, hidden_dim)),
        b2=0.01 * jax.random.normal(ks[3], (hidden_dim,), jnp.float32),
        w3=xavier(ks[4], (c_dim, out_dim)),
        b3=0.01 * jax.random.normal(ks[5], (out_dim,), jnp.float32),
        g1=1.0 + 0.01 * jax.random.normal(ks[6], (c_dim,), jnp.float32),
        be1=0.01 * jax.random.normal(ks[7], (c_dim,), jnp.float32),
        g2=1.0 + 0.01 * jax.random.normal(ks[8], (c_dim,), jnp.float32),
        be2=0.01 * jax.random.normal(ks[9], (c_dim,), jnp.float32),
    )


def ref_env_encoder(x, p, resnet=True):
    """Pure-JAX reference mirroring ENVEncoderBuilder.forward."""
    def ln(v, g, b):
        m = jnp.mean(v, axis=-1, keepdims=True)
        var = jnp.mean((v - m) ** 2, axis=-1, keepdims=True)
        return (v - m) * jax.lax.rsqrt(var + LN_EPS) * g + b

    h = _selu(x @ p["w1"] + p["b1"])
    c = jnp.concatenate([h, x], axis=1) if resnet else h
    c = ln(c, p["g1"], p["be1"])
    h2 = _selu(c @ p["w2"] + p["b2"])
    c2 = jnp.concatenate([h2, x], axis=1) if resnet else h2
    c2 = ln(c2, p["g2"], p["be2"])
    return c2 @ p["w3"] + p["b3"]


if __name__ == "__main__":
    in_dim, hidden_dim, out_dim = 8, 32, 4
    key = jax.random.PRNGKey(0)

    # (batch, resnet): small both-branches check + a multi-tile grid check
    for batch, resnet in ((2, True), (2, False), (1037, True)):
        key, kx = jax.random.split(key)
        x = jax.random.normal(kx, (batch, in_dim), jnp.float32)
        params = init_params(in_dim, out_dim, hidden_dim, resnet=resnet, seed=1)
        out = jax.block_until_ready(env_decoder_forward(x, params, resnet=resnet))
        ref = jax.block_until_ready(ref_env_encoder(x, params, resnet=resnet))
        np.testing.assert_allclose(np.asarray(out), np.asarray(ref),
                                   rtol=1e-5, atol=1e-5)
        assert out.shape == (batch, out_dim)

    print("KERNEL_OK")
</pallas_src>

<mosaic_0001>
module attributes {stable_mosaic.version = 11 : i64} {
  func.func @kernel(%arg0: i32, %arg1: memref<8x8xf32, #tpu.memory_space<vmem>>, %arg2: memref<8x128xf32, #tpu.memory_space<vmem>>, %arg3: memref<8x128xf32, #tpu.memory_space<vmem>>, %arg4: memref<128x128xf32, #tpu.memory_space<vmem>>, %arg5: memref<128x128xf32, #tpu.memory_space<vmem>>, %arg6: memref<8x128xf32, #tpu.memory_space<vmem>>, %arg7: memref<8x4xf32, #tpu.memory_space<vmem>>) attributes {dimension_semantics = [#tpu.dimension_semantics<parallel>], iteration_bounds = array<i64: 1>, scalar_prefetch = 0 : i64, scratch_operands = 0 : i64, tpu.core_type = #tpu.core_type<tc>, window_params = [{transform_indices = @transform_0, window_bounds = array<i64: 8, 8>}, {pipeline_mode = #tpu.pipeline_mode<synchronous>, transform_indices = @transform_1, window_bounds = array<i64: 8, 128>}, {pipeline_mode = #tpu.pipeline_mode<synchronous>, transform_indices = @transform_2, window_bounds = array<i64: 8, 128>}, {pipeline_mode = #tpu.pipeline_mode<synchronous>, transform_indices = @transform_3, window_bounds = array<i64: 128, 128>}, {pipeline_mode = #tpu.pipeline_mode<synchronous>, transform_indices = @transform_4, window_bounds = array<i64: 128, 128>}, {pipeline_mode = #tpu.pipeline_mode<synchronous>, transform_indices = @transform_5, window_bounds = array<i64: 8, 128>}, {transform_indices = @transform_6, window_bounds = array<i64: 8, 4>}]} {
    %c0 = arith.constant 0 : index
    %c0_0 = arith.constant 0 : index
    %0 = vector.load %arg1[%c0, %c0_0] : memref<8x8xf32, #tpu.memory_space<vmem>>, vector<8x8xf32>
    %c0_1 = arith.constant 0 : index
    %c0_2 = arith.constant 0 : index
    %1 = vector.load %arg3[%c0_1, %c0_2] : memref<8x128xf32, #tpu.memory_space<vmem>>, vector<8x128xf32>
    %cst = arith.constant dense<0.000000e+00> : vector<8x128xf32>
    %2 = tpu.matmul %0, %1, %cst {dimension_numbers = #tpu.dot_dimension_numbers<[1], [0], [0], [1], [0, 0, 1, 1], [], []>} : vector<8x8xf32>, vector<8x128xf32>, vector<8x128xf32> -> vector<8x128xf32>
    %c0_3 = arith.constant 0 : index
    %c0_4 = arith.constant 0 : index
    %3 = vector.load %arg2[%c0_3, %c0_4] : memref<8x128xf32, #tpu.memory_space<vmem>>, vector<8x128xf32>
    %c0_5 = arith.constant 0 : index
    %c0_6 = arith.constant 0 : index
    %4 = vector.load %arg4[%c0_5, %c0_6] : memref<128x128xf32, #tpu.memory_space<vmem>>, vector<128x128xf32>
    %c0_7 = arith.constant 0 : index
    %c0_8 = arith.constant 0 : index
    %5 = vector.load %arg5[%c0_7, %c0_8] : memref<128x128xf32, #tpu.memory_space<vmem>>, vector<128x128xf32>
    %c0_9 = arith.constant 0 : index
    %c0_10 = arith.constant 0 : index
    %6 = vector.load %arg6[%c0_9, %c0_10] : memref<8x128xf32, #tpu.memory_space<vmem>>, vector<8x128xf32>
    %7 = vector.extract_strided_slice %6 {offsets = [0, 0], sizes = [1, 128], strides = [1, 1]} : vector<8x128xf32> to vector<1x128xf32>
    %8 = vector.extract_strided_slice %6 {offsets = [1, 0], sizes = [1, 128], strides = [1, 1]} : vector<8x128xf32> to vector<1x128xf32>
    %9 = vector.extract_strided_slice %6 {offsets = [2, 0], sizes = [1, 128], strides = [1, 1]} : vector<8x128xf32> to vector<1x128xf32>
    %10 = vector.extract_strided_slice %6 {offsets = [3, 0], sizes = [1, 128], strides = [1, 1]} : vector<8x128xf32> to vector<1x128xf32>
    %11 = vector.extract_strided_slice %6 {offsets = [4, 0], sizes = [1, 128], strides = [1, 1]} : vector<8x128xf32> to vector<1x128xf32>
    %12 = vector.extract_strided_slice %6 {offsets = [5, 0], sizes = [1, 128], strides = [1, 1]} : vector<8x128xf32> to vector<1x128xf32>
    %13 = vector.extract_strided_slice %6 {offsets = [6, 0], sizes = [1, 128], strides = [1, 1]} : vector<8x128xf32> to vector<1x128xf32>
    %cst_11 = arith.constant dense<0.000000e+00> : vector<8x128xf32>
    %14 = tpu.matmul %0, %3, %cst_11 {dimension_numbers = #tpu.dot_dimension_numbers<[1], [0], [0], [1], [0, 0, 1, 1], [], []>} : vector<8x8xf32>, vector<8x128xf32>, vector<8x128xf32> -> vector<8x128xf32>
    %15 = vector.broadcast %7 : vector<1x128xf32> to vector<8x128xf32>
    %16 = arith.addf %14, %15 : vector<8x128xf32>
    %cst_12 = arith.constant 0.000000e+00 : f32
    %17 = vector.broadcast %cst_12 : f32 to vector<8x128xf32>
    %18 = arith.cmpf ogt, %16, %17 : vector<8x128xf32>
    %19 = math.exp %16 : vector<8x128xf32>
    %cst_13 = arith.constant 1.000000e+00 : f32
    %20 = vector.broadcast %cst_13 : f32 to vector<8x128xf32>
    %21 = arith.subf %19, %20 : vector<8x128xf32>
    %cst_14 = arith.constant 1.67326319 : f32
    %22 = vector.broadcast %cst_14 : f32 to vector<8x128xf32>
    %23 = arith.mulf %22, %21 : vector<8x128xf32>
    %24 = arith.select %18, %16, %23 : vector<8x128xi1>, vector<8x128xf32>
    %cst_15 = arith.constant 1.05070102 : f32
    %25 = vector.broadcast %cst_15 : f32 to vector<8x128xf32>
    %26 = arith.mulf %25, %24 : vector<8x128xf32>
    %27 = arith.addf %26, %2 : vector<8x128xf32>
    %cst_16 = arith.constant dense<0.000000e+00> : vector<8xf32>
    %28 = vector.multi_reduction <add>, %27, %cst_16 [1] : vector<8x128xf32> to vector<8xf32>
    %29 = vector.shape_cast %28 : vector<8xf32> to vector<8x1xf32>
    %cst_17 = arith.constant 2.500000e-02 : f32
    %30 = vector.broadcast %cst_17 : f32 to vector<8x1xf32>
    %31 = arith.mulf %29, %30 : vector<8x1xf32>
    %32 = vector.broadcast %31 : vector<8x1xf32> to vector<8x128xf32>
    %33 = arith.subf %27, %32 : vector<8x128xf32>
    %34 = arith.mulf %33, %33 : vector<8x128xf32>
    %cst_18 = arith.constant dense<0.000000e+00> : vector<8xf32>
    %35 = vector.multi_reduction <add>, %34, %cst_18 [1] : vector<8x128xf32> to vector<8xf32>
    %36 = vector.shape_cast %35 : vector<8xf32> to vector<8x1xf32>
    %37 = arith.mulf %31, %31 : vector<8x1xf32>
    %cst_19 = arith.constant 8.800000e+01 : f32
    %38 = vector.broadcast %cst_19 : f32 to vector<8x1xf32>
    %39 = arith.mulf %38, %37 : vector<8x1xf32>
    %40 = arith.subf %36, %39 : vector<8x1xf32>
    %cst_20 = arith.constant 2.500000e-02 : f32
    %41 = vector.broadcast %cst_20 : f32 to vector<8x1xf32>
    %42 = arith.mulf %40, %41 : vector<8x1xf32>
    %cst_21 = arith.constant 9.99999974E-6 : f32
    %43 = vector.broadcast %cst_21 : f32 to vector<8x1xf32>
    %44 = arith.addf %42, %43 : vector<8x1xf32>
    %45 = math.rsqrt %44 : vector<8x1xf32>
    %46 = vector.broadcast %45 : vector<8x1xf32> to vector<8x128xf32>
    %47 = arith.mulf %33, %46 : vector<8x128xf32>
    %48 = vector.broadcast %9 : vector<1x128xf32> to vector<8x128xf32>
    %49 = arith.mulf %47, %48 : vector<8x128xf32>
    %50 = vector.broadcast %10 : vector<1x128xf32> to vector<8x128xf32>
    %51 = arith.addf %49, %50 : vector<8x128xf32>
    %cst_22 = arith.constant dense<0.000000e+00> : vector<8x128xf32>
    %52 = tpu.matmul %51, %4, %cst_22 {dimension_numbers = #tpu.dot_dimension_numbers<[1], [0], [0], [1], [0, 0, 1, 1], [], []>} : vector<8x128xf32>, vector<128x128xf32>, vector<8x128xf32> -> vector<8x128xf32>
    %53 = vector.broadcast %8 : vector<1x128xf32> to vector<8x128xf32>
    %54 = arith.addf %52, %53 : vector<8x128xf32>
    %cst_23 = arith.constant 0.000000e+00 : f32
    %55 = vector.broadcast %cst_23 : f32 to vector<8x128xf32>
    %56 = arith.cmpf ogt, %54, %55 : vector<8x128xf32>
    %57 = math.exp %54 : vector<8x128xf32>
    %cst_24 = arith.constant 1.000000e+00 : f32
    %58 = vector.broadcast %cst_24 : f32 to vector<8x128xf32>
    %59 = arith.subf %57, %58 : vector<8x128xf32>
    %cst_25 = arith.constant 1.67326319 : f32
    %60 = vector.broadcast %cst_25 : f32 to vector<8x128xf32>
    %61 = arith.mulf %60, %59 : vector<8x128xf32>
    %62 = arith.select %56, %54, %61 : vector<8x128xi1>, vector<8x128xf32>
    %cst_26 = arith.constant 1.05070102 : f32
    %63 = vector.broadcast %cst_26 : f32 to vector<8x128xf32>
    %64 = arith.mulf %63, %62 : vector<8x128xf32>
    %65 = arith.addf %64, %2 : vector<8x128xf32>
    %cst_27 = arith.constant dense<0.000000e+00> : vector<8xf32>
    %66 = vector.multi_reduction <add>, %65, %cst_27 [1] : vector<8x128xf32> to vector<8xf32>
    %67 = vector.shape_cast %66 : vector<8xf32> to vector<8x1xf32>
    %cst_28 = arith.constant 2.500000e-02 : f32
    %68 = vector.broadcast %cst_28 : f32 to vector<8x1xf32>
    %69 = arith.mulf %67, %68 : vector<8x1xf32>
    %70 = vector.broadcast %69 : vector<8x1xf32> to vector<8x128xf32>
    %71 = arith.subf %65, %70 : vector<8x128xf32>
    %72 = arith.mulf %71, %71 : vector<8x128xf32>
    %cst_29 = arith.constant dense<0.000000e+00> : vector<8xf32>
    %73 = vector.multi_reduction <add>, %72, %cst_29 [1] : vector<8x128xf32> to vector<8xf32>
    %74 = vector.shape_cast %73 : vector<8xf32> to vector<8x1xf32>
    %75 = arith.mulf %69, %69 : vector<8x1xf32>
    %cst_30 = arith.constant 8.800000e+01 : f32
    %76 = vector.broadcast %cst_30 : f32 to vector<8x1xf32>
    %77 = arith.mulf %76, %75 : vector<8x1xf32>
    %78 = arith.subf %74, %77 : vector<8x1xf32>
    %cst_31 = arith.constant 2.500000e-02 : f32
    %79 = vector.broadcast %cst_31 : f32 to vector<8x1xf32>
    %80 = arith.mulf %78, %79 : vector<8x1xf32>
    %cst_32 = arith.constant 9.99999974E-6 : f32
    %81 = vector.broadcast %cst_32 : f32 to vector<8x1xf32>
    %82 = arith.addf %80, %81 : vector<8x1xf32>
    %83 = math.rsqrt %82 : vector<8x1xf32>
    %84 = vector.broadcast %83 : vector<8x1xf32> to vector<8x128xf32>
    %85 = arith.mulf %71, %84 : vector<8x128xf32>
    %86 = vector.broadcast %11 : vector<1x128xf32> to vector<8x128xf32>
    %87 = arith.mulf %85, %86 : vector<8x128xf32>
    %88 = vector.broadcast %12 : vector<1x128xf32> to vector<8x128xf32>
    %89 = arith.addf %87, %88 : vector<8x128xf32>
    %cst_33 = arith.constant dense<0.000000e+00> : vector<8x128xf32>
    %90 = tpu.matmul %89, %5, %cst_33 {dimension_numbers = #tpu.dot_dimension_numbers<[1], [0], [0], [1], [0, 0, 1, 1], [], []>} : vector<8x128xf32>, vector<128x128xf32>, vector<8x128xf32> -> vector<8x128xf32>
    %91 = vector.broadcast %13 : vector<1x128xf32> to vector<8x128xf32>
    %92 = arith.addf %90, %91 : vector<8x128xf32>
    %93 = vector.extract_strided_slice %92 {offsets = [0, 0], sizes = [8, 4], strides = [1, 1]} : vector<8x128xf32> to vector<8x4xf32>
    %c0_34 = arith.constant 0 : index
    %c0_35 = arith.constant 0 : index
    %94 = vector.load %arg7[%c0_34, %c0_35] : memref<8x4xf32, #tpu.memory_space<vmem>>, vector<8x4xf32>
    tpu.vector_store %arg7[%c0_34, %c0_35], %93 {strides = array<i32>} : memref<8x4xf32, #tpu.memory_space<vmem>>, vector<8x4xf32>,
    return
  }
  func.func @transform_0(%arg0: i32) -> (i32, i32) {
    %c0_i32 = arith.constant 0 : i32
    %c0_i32_0 = arith.constant 0 : i32
    return %arg0, %c0_i32 : i32, i32
  }
  func.func @transform_1(%arg0: i32) -> (i32, i32) {
    %c0_i32 = arith.constant 0 : i32
    %c0_i32_0 = arith.constant 0 : i32
    %c0_i32_1 = arith.constant 0 : i32
    return %c0_i32, %c0_i32_0 : i32, i32
  }
  func.func @transform_2(%arg0: i32) -> (i32, i32) {
    %c0_i32 = arith.constant 0 : i32
    %c0_i32_0 = arith.constant 0 : i32
    %c0_i32_1 = arith.constant 0 : i32
    return %c0_i32, %c0_i32_0 : i32, i32
  }
  func.func @transform_3(%arg0: i32) -> (i32, i32) {
    %c0_i32 = arith.constant 0 : i32
    %c0_i32_0 = arith.constant 0 : i32
    %c0_i32_1 = arith.constant 0 : i32
    return %c0_i32, %c0_i32_0 : i32, i32
  }
  func.func @transform_4(%arg0: i32) -> (i32, i32) {
    %c0_i32 = arith.constant 0 : i32
    %c0_i32_0 = arith.constant 0 : i32
    %c0_i32_1 = arith.constant 0 : i32
    return %c0_i32, %c0_i32_0 : i32, i32
  }
  func.func @transform_5(%arg0: i32) -> (i32, i32) {
    %c0_i32 = arith.constant 0 : i32
    %c0_i32_0 = arith.constant 0 : i32
    %c0_i32_1 = arith.constant 0 : i32
    return %c0_i32, %c0_i32_0 : i32, i32
  }
  func.func @transform_6(%arg0: i32) -> (i32, i32) {
    %c0_i32 = arith.constant 0 : i32
    %c0_i32_0 = arith.constant 0 : i32
    return %arg0, %c0_i32 : i32, i32
  }
}

</mosaic_0001>

<bundles_post_ra>
// kernel: tpu_custom_call.1
= control target key start
LH: loop header
LB: loop body
LE: loop exit
PB: predicated region body
PF: predicated region fallthrough
CT: control target
= control target key end

     0   :  { %11 = vsyncpa [#allocation3], 0  ;;  %s956_s0 = inlined_call_operand.hbm [shape: f32[8,8], index: 0, kind: input, shape index: {}]   ;;  %s957_s1 = inlined_call_operand.hbm [shape: f32[8,128], index: 1, kind: input, shape index: {}]   ;;  %s958_s2 = inlined_call_operand.hbm [shape: f32[8,128], index: 2, kind: input, shape index: {}]   ;;  %s959_s3 = inlined_call_operand.hbm [shape: f32[128,128], index: 3, kind: input, shape index: {}]   ;;  %s960_s4 = inlined_call_operand.hbm [shape: f32[128,128], index: 4, kind: input, shape index: {}]   ;;  %s961_s5 = inlined_call_operand.vmem [shape: f32[8,128], index: 5, kind: input, shape index: {}]   ;;  %s962_s6 = inlined_call_operand.vmem [shape: f32[8,4], index: 6, kind: output, shape index: {}]  }
   0x1   :  { %12 = vsyncpa [#allocation5], 0 }
   0x2   :  { %13 = vsyncpa [#allocation8], 0  ;;  %s794_s21 = smov [#allocation4]   ;;  %s795_s23 = smov [#allocation7]  }
   0x3   :  { %s30_s22 = sshll.u32 %s794_s21, 4  ;;  %s49_s24 = sshll.u32 %s795_s23, 4  ;;  %s31_s22 = int_to_ptr.vmem [resolvable:$true] %s30_s22  ;;  %s839_s24 = int_to_ptr.vmem [resolvable:$true] %s49_s24 }
   0x4   :  { %s678_s27 = scalar_lea.hbm %s957_s1, 128 }
   0x5   :  { %p679_p0 = scmp.ne.s32.totalorder %s957_s1, %s678_s27  ;;  %p682_p1 = scmp.lt.u32.totalorder %s678_s27, %s957_s1 }
   0x7   :  { %p684_p2 = pnand %p682_p1, %p679_p0 }
   0x9   :  { %687 = shalt.err (!%p684_p2)
}
   0xa   :  { %s688_s8 = scalar_lea.vmem %s31_s22, 128  ;;  %p693_p4 = scmp.lt.s32.totalorder %s31_s22, %s31_s22 }
   0xb   :  { %p689_p3 = scmp.ne.s32.totalorder %s31_s22, %s688_s8  ;;  %p694_p5 = scmp.lt.s32.totalorder %s688_s8, %s688_s8 }
   0xd   :  { %p695_p6 = por %p694_p5, %p693_p4 }
   0xf   :  { %p696_p7 = pnand %p695_p6, %p689_p3 }
  0x11   :  { %699 = shalt.err (!%p696_p7)
}
  0x12   :  { %33 = dma.hbm_to_vmem [thread:$0]  %s957_s1, 128, %s31_s22, [#allocation5]  }
  0x13   :  { %s700_s13 = scalar_lea.hbm %s959_s3, 2048 }
  0x14   :  { %p701_p8 = scmp.ne.s32.totalorder %s959_s3, %s700_s13  ;;  %p704_p9 = scmp.lt.u32.totalorder %s700_s13, %s959_s3 }
  0x16   :  { %p706_p10 = pnand %p704_p9, %p701_p8 }
  0x18   :  { %709 = shalt.err (!%p706_p10)
}
  0x19   :  { %s710_s18 = scalar_lea.vmem %s839_s24, 2048  ;;  %p715_p12 = scmp.lt.s32.totalorder %s839_s24, %s839_s24 }
  0x1a   :  { %p711_p11 = scmp.ne.s32.totalorder %s839_s24, %s710_s18  ;;  %p716_p13 = scmp.lt.s32.totalorder %s710_s18, %s710_s18 }
  0x1c   :  { %p717_p0 = por %p716_p13, %p715_p12 }
  0x1e   :  { %p718_p1 = pnand %p717_p0, %p711_p11 }
  0x20   :  { %721 = shalt.err (!%p718_p1)
}
  0x21   :  { %s796_s1 = smov 128   ;;  %s797_s19 = smov 8  }
  0x22   :  { %55 = dma.hbm_to_vmem [thread:$0]  %s959_s3, 2048, %s839_s24, [#allocation8], %s796_s1, %s796_s1, %s797_s19  }
  0x23   :  { %s798_s22 = smov [#allocation2]   ;;  %s799_s25 = smov [#allocation6]  }
  0x24   :  { %s20_s23 = sshll.u32 %s798_s22, 4  ;;  %s40_s26 = sshll.u32 %s799_s25, 4  ;;  %s21_s23 = int_to_ptr.vmem [resolvable:$true] %s20_s23  ;;  %s41_s26 = int_to_ptr.vmem [resolvable:$true] %s40_s26 }
  0x25   :  { %s722_s29 = scalar_lea.hbm %s956_s0, 128 }
  0x26   :  { %p723_p2 = scmp.ne.s32.totalorder %s956_s0, %s722_s29  ;;  %p726_p3 = scmp.lt.u32.totalorder %s722_s29, %s956_s0 }
  0x28   :  { %p728_p4 = pnand %p726_p3, %p723_p2 }
  0x2a   :  { %731 = shalt.err (!%p728_p4)
}
  0x2b   :  { %s732_s3 = scalar_lea.vmem %s21_s23, 128  ;;  %p737_p6 = scmp.lt.s32.totalorder %s21_s23, %s21_s23 }
  0x2c   :  { %p733_p5 = scmp.ne.s32.totalorder %s21_s23, %s732_s3  ;;  %p738_p7 = scmp.lt.s32.totalorder %s732_s3, %s732_s3 }
  0x2e   :  { %p739_p8 = por %p738_p7, %p737_p6 }
  0x30   :  { %p740_p9 = pnand %p739_p8, %p733_p5 }
  0x32   :  { %743 = shalt.err (!%p740_p9)
}
  0x33   :  { %23 = dma.hbm_to_vmem [thread:$0]  %s956_s0, 128, %s21_s23, [#allocation3]  }
  0x34   :  { %s744_s13 = scalar_lea.hbm %s958_s2, 128 }
  0x35   :  { %p745_p10 = scmp.ne.s32.totalorder %s958_s2, %s744_s13  ;;  %p748_p11 = scmp.lt.u32.totalorder %s744_s13, %s958_s2 }
  0x37   :  { %p750_p12 = pnand %p748_p11, %p745_p10 }
  0x39   :  { %753 = shalt.err (!%p750_p12)
}
  0x3a   :  { %s754_s18 = scalar_lea.vmem %s41_s26, 128  ;;  %p759_p0 = scmp.lt.s32.totalorder %s41_s26, %s41_s26 }
  0x3b   :  { %p755_p13 = scmp.ne.s32.totalorder %s41_s26, %s754_s18  ;;  %p760_p1 = scmp.lt.s32.totalorder %s754_s18, %s754_s18 }
  0x3d   :  { %p761_p2 = por %p760_p1, %p759_p0 }
  0x3f   :  { %p762_p3 = pnand %p761_p2, %p755_p13 }
  0x41   :  { %765 = shalt.err (!%p762_p3)
}
  0x42   :  { %43 = dma.hbm_to_vmem [thread:$0]  %s958_s2, 128, %s41_s26, [#allocation5]  }
  0x43   :  { %s800_s21 = smov [#allocation9]   ;;  %s766_s27 = scalar_lea.hbm %s960_s4, 2048 }
  0x44   :  { %s61_s22 = sshll.u32 %s800_s21, 4  ;;  %p767_p4 = scmp.ne.s32.totalorder %s960_s4, %s766_s27  ;;  %s62_s22 = int_to_ptr.vmem [resolvable:$true] %s61_s22 }
  0x45   :  { %p770_p5 = scmp.lt.u32.totalorder %s766_s27, %s960_s4 }
  0x47   :  { %p772_p6 = pnand %p770_p5, %p767_p4 }
  0x49   :  { %775 = shalt.err (!%p772_p6)
}
  0x4a   :  { %s776_s8 = scalar_lea.vmem %s62_s22, 2048  ;;  %p781_p8 = scmp.lt.s32.totalorder %s62_s22, %s62_s22 }
  0x4b   :  { %p777_p7 = scmp.ne.s32.totalorder %s62_s22, %s776_s8  ;;  %p782_p9 = scmp.lt.s32.totalorder %s776_s8, %s776_s8 }
  0x4d   :  { %p783_p10 = por %p782_p9, %p781_p8 }
  0x4f   :  { %p784_p11 = pnand %p783_p10, %p777_p7 }
  0x51   :  { %787 = shalt.err (!%p784_p11)
}
  0x52   :  { %67 = dma.hbm_to_vmem [thread:$0]  %s960_s4, 2048, %s62_s22, [#allocation8], %s796_s1, %s796_s1, %s797_s19  }
  0x53   :  { %788 = dma.done.wait [#allocation3], 128  }
  0x54   :  { %789 = vsyncadd [#allocation3], 4294967168 }
  0x55   :  { %790 = dma.done.wait [#allocation5], 256  }
  0x56   :  { %791 = vsyncadd [#allocation5], 4294967040 }
  0x57   :  { %792 = dma.done.wait [#allocation8], 4096  }
  0x58   :  { %793 = vsyncadd [#allocation8], 4294963200  ;;  %v801_v0 = vmov 0.0   ;;  %vm802_vm0 = vmmov 0   ;;  %vm87_vm1 = vcmask 64512   ;;  %v161_v1 = vld [vmem:[#allocation4] sm:$0xff]  ;;  %v195_v4 = vlaneseq }
  0x59   :  { %537 = vmatprep.subr.mxu1 %v801_v0  ;;  %539 = vmatprep.mubr.msk.f32.mxu1 %vm802_vm0, %v801_v0  ;;  %v85_v2 = vld [vmem:[#allocation2] sm:$0xff]  ;;  %v86_v3 = vld [vmem:[#allocation6] sm:$0xff]  ;;  %v162_v21 = vld [vmem:[#allocation7] sm:$0xff]  ;;  %v803_v24 = vmov 0.0|0.0   ;;  %vm481_vm4 = vcmask 31744  }
  0x5a   :  { %532 = vmatprep.subr.mxu0 %v801_v0  ;;  %534 = vmatprep.mubr.msk.f32.mxu0 %vm802_vm0, %v801_v0  ;;  %v912_v5 = vshrl.u32 %v195_v4, 7  ;;  %v918_v7 = vld [vmem:[%s961_s5] sm:$0xff]  ;;  %v164_v23 = vld [vmem:[#allocation7 + $0x10] sm:$0xff]  ;;  %v165_v26 = vld [vmem:[#allocation7 + $0x18] sm:$0xff] }
  0x5b   :  { %538 = vmatpush3.msra.mxu1 %v161_v1  ;;  %533 = vmatpush3.msra.mxu0 %v86_v3  ;;  %v163_v22 = vld [vmem:[#allocation7 + $0x8] sm:$0xff]  ;;  %v616_v27 = vpack.c.bf16 %v165_v26, %v164_v23  ;;  %v166_v32 = vld [vmem:[#allocation7 + $0x20] sm:$0xff]  ;;  %v168_v35 = vld [vmem:[#allocation7 + $0x30] sm:$0xff] }
  0x5c   :  { %540 = vmatmul.mubr.msk.f32.vlgmr.msra.gmra.mrb[0].mxu1 %vm87_vm1, %v85_v2  ;;  %535 = vmatmul.mubr.msk.f32.vlgmr.msra.gmra.mrb[0].mxu0 %vm87_vm1, %v85_v2  ;;  %v197_v6 = vsub.s32 0, %v912_v5  ;;  %v613_v25 = vpack.c.bf16 %v163_v22, %v162_v21  ;;  %v167_v33 = vld [vmem:[#allocation7 + $0x28] sm:$0xff]  ;;  %v169_v36 = vld [vmem:[#allocation7 + $0x38] sm:$0xff]  ;;  %v170_v38 = vld [vmem:[#allocation7 + $0x40] sm:$0xff]  ;;  %v293_v56 = vsub.s32 2, %v912_v5  ;;  %v298_v57 = vsub.s32 3, %v912_v5 }
  0x5d   :  { %574 = vmatprep.mubr.msk.f32.mxu0 %vm802_vm0, %v801_v0  ;;  %609 = vmatprep.mubr.msk.f32.mxu1 %vm802_vm0, %v801_v0  ;;  %v619_v34 = vpack.c.bf16 %v167_v33, %v166_v32  ;;  %v622_v37 = vpack.c.bf16 %v169_v36, %v168_v35  ;;  %v171_v39 = vld [vmem:[#allocation7 + $0x48] sm:$0xff]  ;;  %v172_v41 = vld [vmem:[#allocation7 + $0x50] sm:$0xff]  ;;  %v173_v42 = vld [vmem:[#allocation7 + $0x58] sm:$0xff]  ;;  %v303_v0 = vsub.s32 1, %v912_v5 }
  0x5e   :  { %v198_v8 = vrot.slane %v918_v7, %v197_v6  ;;  %612 = vmatprep.subr.bf16.mxu0 %v803_v24  ;;  %636 = vmatprep.subr.bf16.mxu1 %v803_v24  ;;  %v625_v40 = vpack.c.bf16 %v171_v39, %v170_v38  ;;  %v628_v43 = vpack.c.bf16 %v173_v42, %v172_v41  ;;  %v174_v44 = vld [vmem:[#allocation7 + $0x60] sm:$0xff]  ;;  %v175_v45 = vld [vmem:[#allocation7 + $0x68] sm:$0xff]  ;;  %v176_v47 = vld [vmem:[#allocation7 + $0x70] sm:$0xff] }
  0x5f   :  { %614 = vmatpush3.bf16.msra.mxu0 %v613_v25  ;;  %v631_v46 = vpack.c.bf16 %v175_v45, %v174_v44  ;;  %v177_v48 = vld [vmem:[#allocation7 + $0x78] sm:$0xff]  ;;  %v294_v58 = vrot.slane %v918_v7, %v293_v56  ;;  %v299_v61 = vrot.slane %v918_v7, %v298_v57  ;;  %v304_v1 = vrot.slane %v918_v7, %v303_v0  ;;  %v182_v26 = vld [vmem:[#allocation9 + $0x20] sm:$0xff]  ;;  %v187_v32 = vld [vmem:[#allocation9 + $0x48] sm:$0xff] }
  0x60   :  { %615 = vmatprep.subr.bf16.mxu0 %v803_v24  ;;  %v634_v49 = vpack.c.bf16 %v177_v48, %v176_v47  ;;  %v189_v35 = vld [vmem:[#allocation9 + $0x58] sm:$0xff]  ;;  %v191_v38 = vld [vmem:[#allocation9 + $0x68] sm:$0xff]  ;;  %v409_v56 = vsub.s32 6, %v912_v5 }
  0x61   :  { %v193_v41 = vld [vmem:[#allocation9 + $0x78] sm:$0xff] }
  0x62   :  { %v410_v57 = vrot.slane %v918_v7, %v409_v56 }
  0x63   :  { %617 = vmatpush3.bf16.msra.mxu0 %v616_v27 }
  0x64   :  { %618 = vmatprep.subr.bf16.mxu0 %v803_v24 }
  0x67   :  { %620 = vmatpush3.bf16.msra.mxu0 %v619_v34  ;;  %v188_v34 = vld [vmem:[#allocation9 + $0x50] sm:$0xff] }
  0x68   :  { %621 = vmatprep.subr.bf16.mxu0 %v803_v24  ;;  %v652_v36 = vpack.c.bf16 %v189_v35, %v188_v34 }
  0x6b   :  { %623 = vmatpush3.bf16.msra.mxu0 %v622_v37  ;;  %v190_v37 = vld [vmem:[#allocation9 + $0x60] sm:$0xff] }
  0x6c   :  { %624 = vmatprep.subr.bf16.mxu0 %v803_v24  ;;  %v655_v39 = vpack.c.bf16 %v191_v38, %v190_v37 }
  0x6f   :  { %626 = vmatpush3.bf16.msra.mxu0 %v625_v40  ;;  %v192_v40 = vld [vmem:[#allocation9 + $0x70] sm:$0xff] }
  0x70   :  { %627 = vmatprep.subr.bf16.mxu0 %v803_v24  ;;  %v658_v42 = vpack.c.bf16 %v193_v41, %v192_v40 }
  0x73   :  { %629 = vmatpush3.bf16.msra.mxu0 %v628_v43 }
  0x74   :  { %630 = vmatprep.subr.bf16.mxu0 %v803_v24 }
  0x77   :  { %632 = vmatpush3.bf16.msra.mxu0 %v631_v46 }
  0x78   :  { %633 = vmatprep.subr.bf16.mxu0 %v803_v24 }
  0x7b   :  { %635 = vmatpush3.bf16.msra.mxu0 %v634_v49  ;;  %v399_v49 = vsub.s32 4, %v912_v5 }
 0x12f   :  { %v265_v9 = vpop.f32.mrb[0].mxu1  ;;  %v921_v10 = vpop.f32.mrb[0].mxu0 }
 0x130   :  { %v266_v11 = vadd.f32 %v265_v9, %v198_v8  ;;  %v541_v12 = vpop.f32.mrb[1].mxu1  ;;  %v536_v13 = vpop.f32.mrb[1].mxu0 }
 0x132   :  { %v270_v14 = vmul.f32 1.442695, %v266_v11  ;;  %vm269_vm2 = vcmp.gt.f32.partialorder %v266_v11, 0.0 }
 0x134   :  { %670 = vpow2.f32 %v270_v14 }
 0x13e   :  { %v671_v15 = vpop.eup %670 }
 0x13f   :  { %v492_v16 = vadd.f32 -1.0, %v671_v15  ;;  %v178_v15 = vld [vmem:[#allocation9] sm:$0xff] }
 0x141   :  { %v273_v17 = vmul.f32 1.6732632, %v492_v16  ;;  %v179_v16 = vld [vmem:[#allocation9 + $0x8] sm:$0xff] }
 0x143   :  { %v274_v18 = vsel %vm269_vm2, %v266_v11, %v273_v17  ;;  %v180_v17 = vld [vmem:[#allocation9 + $0x10] sm:$0xff] }
 0x144   :  { %v275_v19 = vmul.f32 1.050701, %v274_v18  ;;  %v637_v18 = vpack.c.bf16 %v179_v16, %v178_v15 }
 0x146   :  { %v276_v20 = vadd.f32 %v275_v19, %v921_v10  ;;  %v181_v19 = vld [vmem:[#allocation9 + $0x18] sm:$0xff]  ;;  %638 = vmatpush3.bf16.msra.mxu1 %v637_v18 }
 0x147   :  { %639 = vmatprep.subr.bf16.mxu1 %v803_v24 }
 0x148   :  { %277 = vadd.xlane.f32.xlu0 %v276_v20 }
 0x1d5   :  { %v278_v28 = vpop.xlane.xlu0 %277 }
 0x1d6   :  { %v279_v29 = vmul.f32 0.025, %v278_v28  ;;  %v184_v28 = vld [vmem:[#allocation9 + $0x30] sm:$0xff] }
 0x1d8   :  { %v280_v30 = vsub.f32 %v276_v20, %v279_v29  ;;  %v284_v50 = vmul.f32 %v279_v29, %v279_v29  ;;  %v640_v20 = vpack.c.bf16 %v181_v19, %v180_v17  ;;  %v185_v29 = vld [vmem:[#allocation9 + $0x38] sm:$0xff] }
 0x1da   :  { %v281_v31 = vmul.f32 %v280_v30, %v280_v30  ;;  %v285_v51 = vmul.f32 88.0, %v284_v50  ;;  %641 = vmatpush3.bf16.msra.mxu1 %v640_v20  ;;  %v404_v50 = vsub.s32 5, %v912_v5 }
 0x1db   :  { %642 = vmatprep.subr.bf16.mxu1 %v803_v24 }
 0x1dc   :  { %282 = vadd.xlane.f32.xlu0 %v281_v31  ;;  %v186_v31 = vld [vmem:[#allocation9 + $0x40] sm:$0xff] }
 0x1dd   :  { %v649_v33 = vpack.c.bf16 %v187_v32, %v186_v31 }
 0x269   :  { %v283_v52 = vpop.xlane.xlu0 %282 }
 0x26a   :  { %v286_v53 = vsub.f32 %v283_v52, %v285_v51  ;;  %v400_v51 = vrot.slane %v918_v7, %v399_v49 }
 0x26c   :  { %v287_v54 = vmul.f32 0.025, %v286_v53 }
 0x26e   :  { %v288_v55 = vadd.f32 1e-05, %v287_v54  ;;  %v405_v54 = vrot.slane %v918_v7, %v404_v50 }
 0x270   :  { %672 = vrsqrt.f32 %v288_v55 }
 0x27a   :  { %v673_v59 = vpop.eup %672 }
 0x27b   :  { %v290_v60 = vmul.f32 %v673_v59, %v280_v30  ;;  %v646_v30 = vpack.c.bf16 %v185_v29, %v184_v28 }
 0x27d   :  { %v295_v62 = vmul.f32 %v294_v58, %v290_v60 }
 0x27f   :  { %v300_v63 = vadd.f32 %v299_v61, %v295_v62 }
 0x281   :  { %575 = vmatmul.mubr.f32.vlgmr.msra.gmra.mrb[2].mxu0 %v300_v63 }
 0x354   :  { %v371_v2 = vpop.f32.mrb[2].mxu0 }
 0x355   :  { %v372_v3 = vadd.f32 %v371_v2, %v304_v1  ;;  %v576_v4 = vpop.f32.mrb[3].mxu0 }
 0x357   :  { %v376_v6 = vmul.f32 1.442695, %v372_v3  ;;  %vm375_vm3 = vcmp.gt.f32.partialorder %v372_v3, 0.0 }
 0x359   :  { %674 = vpow2.f32 %v376_v6 }
 0x363   :  { %v675_v8 = vpop.eup %674 }
 0x364   :  { %v493_v9 = vadd.f32 -1.0, %v675_v8 }
 0x366   :  { %v379_v11 = vmul.f32 1.6732632, %v493_v9 }
 0x368   :  { %v380_v12 = vsel %vm375_vm3, %v372_v3, %v379_v11 }
 0x369   :  { %v381_v13 = vmul.f32 1.050701, %v380_v12 }
 0x36b   :  { %v382_v14 = vadd.f32 %v381_v13, %v921_v10  ;;  %v183_v10 = vld [vmem:[#allocation9 + $0x28] sm:$0xff] }
 0x36c   :  { %v643_v27 = vpack.c.bf16 %v183_v10, %v182_v26 }
 0x36d   :  { %383 = vadd.xlane.f32.xlu1 %v382_v14 }
 0x36e   :  { %644 = vmatpush3.bf16.msra.mxu1 %v643_v27 }
 0x36f   :  { %645 = vmatprep.subr.bf16.mxu1 %v803_v24 }
 0x372   :  { %647 = vmatpush3.bf16.msra.mxu1 %v646_v30 }
 0x373   :  { %648 = vmatprep.subr.bf16.mxu1 %v803_v24 }
 0x376   :  { %650 = vmatpush3.bf16.msra.mxu1 %v649_v33 }
 0x377   :  { %651 = vmatprep.subr.bf16.mxu1 %v803_v24 }
 0x37a   :  { %653 = vmatpush3.bf16.msra.mxu1 %v652_v36 }
 0x37b   :  { %654 = vmatprep.subr.bf16.mxu1 %v803_v24 }
 0x37e   :  { %656 = vmatpush3.bf16.msra.mxu1 %v655_v39 }
 0x37f   :  { %657 = vmatprep.subr.bf16.mxu1 %v803_v24 }
 0x382   :  { %659 = vmatpush3.bf16.msra.mxu1 %v658_v42 }
 0x3fa   :  { %v384_v21 = vpop.xlane.xlu1 %383 }
 0x3fb   :  { %v385_v22 = vmul.f32 0.025, %v384_v21 }
 0x3fd   :  { %v386_v23 = vsub.f32 %v382_v14, %v385_v22  ;;  %v390_v43 = vmul.f32 %v385_v22, %v385_v22 }
 0x3ff   :  { %v387_v25 = vmul.f32 %v386_v23, %v386_v23  ;;  %v391_v44 = vmul.f32 88.0, %v390_v43 }
 0x401   :  { %388 = vadd.xlane.f32.xlu1 %v387_v25 }
 0x48e   :  { %v389_v45 = vpop.xlane.xlu1 %388 }
 0x48f   :  { %v392_v46 = vsub.f32 %v389_v45, %v391_v44 }
 0x491   :  { %v393_v47 = vmul.f32 0.025, %v392_v46 }
 0x493   :  { %v394_v48 = vadd.f32 1e-05, %v393_v47 }
 0x495   :  { %676 = vrsqrt.f32 %v394_v48 }
 0x49f   :  { %v677_v52 = vpop.eup %676 }
 0x4a0   :  { %v396_v53 = vmul.f32 %v677_v52, %v386_v23 }
 0x4a2   :  { %v401_v55 = vmul.f32 %v400_v51, %v396_v53 }
 0x4a4   :  { %v406_v24 = vadd.f32 %v405_v54, %v401_v55 }
 0x4a6   :  { %610 = vmatmul.mubr.f32.vlgmr.msra.gmra.mrb[2].mxu1 %v406_v24 }
 0x579   :  { %v477_v58 = vpop.f32.mrb[2].mxu1 }
 0x57a   :  { %v478_v59 = vadd.f32 %v477_v58, %v410_v57  ;;  %v611_v60 = vpop.f32.mrb[3].mxu1 }
 0x57c   :  { %482 = vst.msk [vmem:[%s962_s6] sm:$0xff] %vm481_vm4, %v478_v59 }
 0x57d   :  { %487 = vsyncpa [#allocation3], 1 }
 0x57e   :  { %488 = vsyncpa [#allocation5], 1 }
 0x57f   :  { %489 = vsyncpa [#allocation8], 1 }

</bundles_post_ra>
